<compile_context>
chip_gen: v5e
topology: v5e:2x2
jax: 0.10.0
libtpu: 0.0.40
codegen_flags: <defaults>
</compile_context>

<pallas_src>
import math

import jax
import jax.numpy as jnp
from jax.experimental import pallas as pl
from jax.experimental.pallas import tpu as pltpu


# --------------------------------------------------------------------------------------
# Kernel: stacked RGCN combine   out_tile = [x | agg_0..agg_{R-1}]_tile @ W_stacked + bias
# --------------------------------------------------------------------------------------
def _rgcn_stacked_kernel(feat_ref, w_ref, bias_ref, out_ref):
    # feat_ref : (TN, (R+1)*H) bf16  stacked node features + per-relation aggregates
    # w_ref    : ((R+1)*H, H)  bf16  stacked [root; W_0; ..; W_{R-1}]   (resident)
    # bias_ref : (1, H)        f32                                      (resident)
    # out_ref  : (TN, H)       f32   2-D output block
    out_ref[...] = (
        jnp.dot(feat_ref[...], w_ref[...], preferred_element_type=jnp.float32)
        + bias_ref[...]
    )


# --------------------------------------------------------------------------------------
# Glue: per-relation mean aggregation of neighbor features (sparse gather/scatter).
# --------------------------------------------------------------------------------------
def _relation_mean_aggregate(x, edge_index, edge_type, num_relations):
    src = edge_index[0].astype(jnp.int32)
    dst = edge_index[1].astype(jnp.int32)
    n, h = x.shape
    seg = edge_type.astype(jnp.int32) * n + dst                       # (E,)
    msg = jnp.take(x, src, axis=0)                                    # (E, H)
    summed = jnp.zeros((num_relations * n, h), jnp.float32).at[seg].add(msg)
    counts = jnp.zeros((num_relations * n,), jnp.float32).at[seg].add(1.0)
    agg = summed / jnp.maximum(counts, 1.0)[:, None]
    return agg.reshape(num_relations, n, h)                           # (R, N, H)


def _round_up(x, m):
    return ((x + m - 1) // m) * m


def _pick_row_tile(n, feat_cols, out_cols, vmem_budget_bytes=16 * 1024 * 1024):
    """Row tile: large (mem-bound kernel), sublane-aligned, VMEM-budgeted,
    and >= 2 grid steps when the graph allows it (v7x megacore balance)."""
    align = 16  # bf16 sublane packing
    # double-buffered feat (bf16) + double-buffered out (f32) per row
    bytes_per_row = 2 * feat_cols * 2 + 2 * out_cols * 4
    max_rows = max(align, vmem_budget_bytes // max(bytes_per_row, 1))
    tile = min(2048, max_rows)
    tile = max(align, (tile // align) * align)
    n_pad = _round_up(n, align)
    if tile >= n_pad:
        tile = n_pad
        half = n_pad // 2
        if half >= align and half % align == 0:
            tile = half  # keep 2 parallel grid steps for the 2 TCs on v7x
    return tile


# --------------------------------------------------------------------------------------
# Forward wrapper (matches TokenEmbedding.forward)
# --------------------------------------------------------------------------------------
def token_embedding_forward(params, edge_index, edge_type):
    node_embeds = params["node_embeds"].astype(jnp.float32)           # (N, H)
    basis = params["basis"].astype(jnp.float32)                       # (B, H, H)
    comp = params["comp"].astype(jnp.float32)                         # (R, B)
    root = params["root"].astype(jnp.float32)                         # (H, H)
    bias = params["bias"].astype(jnp.float32).reshape(1, -1)          # (1, H)
    special = params["special_token_embeddings"].astype(jnp.float32)  # (S, H)

    N, H = node_embeds.shape
    R, B = comp.shape
    K = (R + 1) * H

    # ---- relation weights from the basis decomposition (tiny; plain einsum) ----
    rel_w = jnp.einsum("rb,bij->rij", comp, basis)                    # (R, H, H)
    w_stacked = jnp.concatenate([root[None], rel_w], axis=0).reshape(K, H)
    w_stacked = w_stacked.astype(jnp.bfloat16)                        # resident, bf16

    # ---- glue: sparse per-relation mean aggregation -> (R, N, H) ----
    agg = _relation_mean_aggregate(node_embeds, edge_index, edge_type, R)

    # ---- stacked feature matrix [x | agg_0 | ... | agg_{R-1}] -> (N, (R+1)*H), bf16 ----
    feats = jnp.concatenate(
        [node_embeds[:, None, :], jnp.transpose(agg, (1, 0, 2))], axis=1
    ).reshape(N, K).astype(jnp.bfloat16)

    # ---- tiling: pad rows, pick VMEM-budgeted tile ----
    TN = _pick_row_tile(N, feat_cols=K, out_cols=H)
    N_pad = _round_up(N, TN)
    if N_pad != N:
        feats = jnp.pad(feats, ((0, N_pad - N), (0, 0)))
    grid_n = N_pad // TN

    # ---- Pallas kernel: one stacked matmul per node tile ----
    node_out = pl.pallas_call(
        _rgcn_stacked_kernel,
        out_shape=jax.ShapeDtypeStruct((N_pad, H), jnp.float32),
        grid=(grid_n,),
        in_specs=[
            pl.BlockSpec((TN, K), lambda i: (i, 0)),      # stacked feature tile
            pl.BlockSpec((K, H), lambda i: (0, 0)),       # W_stacked (resident)
            pl.BlockSpec((1, H), lambda i: (0, 0)),       # bias      (resident)
        ],
        out_specs=pl.BlockSpec((TN, H), lambda i: (i, 0)),
        compiler_params=pltpu.CompilerParams(
            dimension_semantics=("parallel",)),
    )(feats, w_stacked, bias)

    node_out = node_out[:N]

    # ---- glue: concat the special-token embedding table ----
    return jnp.concatenate([node_out, special], axis=0)


# --------------------------------------------------------------------------------------
# Pure-JAX (f32) reference of the same forward pass
# --------------------------------------------------------------------------------------
def _reference_forward(params, edge_index, edge_type, num_relations):
    x = params["node_embeds"].astype(jnp.float32)
    N, H = x.shape
    weight = jnp.einsum("rb,bij->rij", params["comp"], params["basis"])  # (R, H, H)
    src, dst = edge_index[0], edge_index[1]
    out = x @ params["root"] + params["bias"][None, :]
    for r in range(num_relations):
        sel = (edge_type == r).astype(jnp.float32)                       # (E,)
        msg = jnp.take(x, src, axis=0) * sel[:, None]                    # (E, H)
        summed = jnp.zeros((N, H), jnp.float32).at[dst].add(msg)
        cnt = jnp.zeros((N,), jnp.float32).at[dst].add(sel)
        agg = summed / jnp.maximum(cnt, 1.0)[:, None]
        out = out + agg @ weight[r]
    return jnp.concatenate([out, params["special_token_embeddings"]], axis=0)


if __name__ == "__main__":
    # small shapes consistent with the module's constructor / forward
    hidden_size = 32
    num_relations = 4
    num_bases = 2
    num_entities = 64
    num_special_tokens = 8
    num_edges = 128

    key = jax.random.PRNGKey(0)
    ks = jax.random.split(key, 9)

    stdv = math.sqrt(6.0 / (num_entities + hidden_size))
    node_embeds = jax.random.uniform(
        ks[0], (num_entities, hidden_size), jnp.float32, -stdv, stdv)
    basis = 0.1 * jax.random.normal(ks[1], (num_bases, hidden_size, hidden_size), jnp.float32)
    comp = 0.1 * jax.random.normal(ks[2], (num_relations, num_bases), jnp.float32)
    root = 0.1 * jax.random.normal(ks[3], (hidden_size, hidden_size), jnp.float32)
    bias = 0.01 * jax.random.normal(ks[4], (hidden_size,), jnp.float32)
    special = 0.1 * jax.random.normal(ks[5], (num_special_tokens, hidden_size), jnp.float32)
    special = special.at[0].set(0.0)  # nn.Embedding padding_idx=0

    src = jax.random.randint(ks[6], (num_edges,), 0, num_entities)
    dst = jax.random.randint(ks[7], (num_edges,), 0, num_entities)
    edge_index = jnp.stack([src, dst], axis=0).astype(jnp.int32)
    edge_type = jax.random.randint(ks[8], (num_edges,), 0, num_relations).astype(jnp.int32)

    params = {
        "node_embeds": node_embeds,
        "basis": basis,
        "comp": comp,
        "root": root,
        "bias": bias,
        "special_token_embeddings": special,
    }

    token_embeds = jax.jit(token_embedding_forward)(params, edge_index, edge_type)
    token_embeds = jax.block_until_ready(token_embeds)

    ref = _reference_forward(params, edge_index, edge_type, num_relations)
    assert token_embeds.shape == (num_entities + num_special_tokens, hidden_size)
    # bf16 feature/weight streams (f32 MXU accumulation) -> bf16-level tolerance vs f32 ref
    assert jnp.allclose(token_embeds, ref, atol=1e-2, rtol=1e-2)

    print("KERNEL_OK")
</pallas_src>

<mosaic_0001>
module attributes {stable_mosaic.version = 11 : i64} {
  func.func @_rgcn_stacked_kernel(%arg0: i32, %arg1: memref<32x160xbf16, #tpu.memory_space<vmem>>, %arg2: memref<160x32xbf16, #tpu.memory_space<vmem>>, %arg3: memref<1x32xf32, #tpu.memory_space<vmem>>, %arg4: memref<32x32xf32, #tpu.memory_space<vmem>>) attributes {dimension_semantics = [#tpu.dimension_semantics<parallel>], iteration_bounds = array<i64: 2>, scalar_prefetch = 0 : i64, scratch_operands = 0 : i64, tpu.core_type = #tpu.core_type<tc>, window_params = [{transform_indices = @transform_0, window_bounds = array<i64: 32, 160>}, {pipeline_mode = #tpu.pipeline_mode<synchronous>, transform_indices = @transform_1, window_bounds = array<i64: 160, 32>}, {pipeline_mode = #tpu.pipeline_mode<synchronous>, transform_indices = @transform_2, window_bounds = array<i64: 1, 32>}, {transform_indices = @transform_3, window_bounds = array<i64: 32, 32>}]} {
    %c0 = arith.constant 0 : index
    %c0_0 = arith.constant 0 : index
    %0 = vector.load %arg1[%c0, %c0_0] : memref<32x160xbf16, #tpu.memory_space<vmem>>, vector<32x160xbf16>
    %c0_1 = arith.constant 0 : index
    %c0_2 = arith.constant 0 : index
    %1 = vector.load %arg2[%c0_1, %c0_2] : memref<160x32xbf16, #tpu.memory_space<vmem>>, vector<160x32xbf16>
    %cst = arith.constant dense<0.000000e+00> : vector<32x32xf32>
    %2 = tpu.matmul %0, %1, %cst {dimension_numbers = #tpu.dot_dimension_numbers<[1], [0], [0], [1], [0, 0, 1, 1], [], []>} : vector<32x160xbf16>, vector<160x32xbf16>, vector<32x32xf32> -> vector<32x32xf32>
    %c0_3 = arith.constant 0 : index
    %c0_4 = arith.constant 0 : index
    %3 = vector.load %arg3[%c0_3, %c0_4] : memref<1x32xf32, #tpu.memory_space<vmem>>, vector<1x32xf32>
    %4 = vector.broadcast %3 : vector<1x32xf32> to vector<32x32xf32>
    %5 = arith.addf %2, %4 : vector<32x32xf32>
    %c0_5 = arith.constant 0 : index
    %c0_6 = arith.constant 0 : index
    %6 = vector.load %arg4[%c0_5, %c0_6] : memref<32x32xf32, #tpu.memory_space<vmem>>, vector<32x32xf32>
    tpu.vector_store %arg4[%c0_5, %c0_6], %5 {strides = array<i32>} : memref<32x32xf32, #tpu.memory_space<vmem>>, vector<32x32xf32>,
    return
  }
  func.func @transform_0(%arg0: i32) -> (i32, i32) {
    %c0_i32 = arith.constant 0 : i32
    %c0_i32_0 = arith.constant 0 : i32
    return %arg0, %c0_i32 : i32, i32
  }
  func.func @transform_1(%arg0: i32) -> (i32, i32) {
    %c0_i32 = arith.constant 0 : i32
    %c0_i32_0 = arith.constant 0 : i32
    %c0_i32_1 = arith.constant 0 : i32
    return %c0_i32, %c0_i32_0 : i32, i32
  }
  func.func @transform_2(%arg0: i32) -> (i32, i32) {
    %c0_i32 = arith.constant 0 : i32
    %c0_i32_0 = arith.constant 0 : i32
    %c0_i32_1 = arith.constant 0 : i32
    return %c0_i32, %c0_i32_0 : i32, i32
  }
  func.func @transform_3(%arg0: i32) -> (i32, i32) {
    %c0_i32 = arith.constant 0 : i32
    %c0_i32_0 = arith.constant 0 : i32
    return %arg0, %c0_i32 : i32, i32
  }
}

</mosaic_0001>

<bundles_post_ra>
// kernel: token_embedding_forward.1
= control target key start
LH: loop header
LB: loop body
LE: loop exit
PB: predicated region body
PF: predicated region fallthrough
CT: control target
= control target key end

     0   :  { %s519_s12 = smov 0   ;;  %s582_s0 = inlined_call_operand.vmem [shape: bf16[64,160], index: 0, kind: input, shape index: {}]   ;;  %s583_s1 = inlined_call_operand.vmem [shape: bf16[160,32], index: 1, kind: input, shape index: {}]   ;;  %s584_s2 = inlined_call_operand.vmem [shape: f32[1,32], index: 2, kind: input, shape index: {}]   ;;  %s585_s3 = inlined_call_operand.vmem [shape: f32[64,32], index: 3, kind: output, shape index: {}]  }
   0x1 LB: > { %s389_s13 = sadd.s32 4294967295, %s497_s12   ;;  %p393_p0 = scmp.ge.s32.totalorder %s497_s12, 1  ;;  %s497_s12 = sphi %s519_s12, %s13_s12  }
   0x2   : > { %p139_p1 = scmp.lt.s32.totalorder %s497_s12, 3 }
   0x4   : > { %p140_p2 = pnand %p393_p0, %p139_p1 }
   0x5   : > { %s394_s16 = sshll.u32 (!%p140_p2), %s389_s13, 2 }
   0x6   : > { %143 = sbr.rel (%p140_p2) target bundleno = 188 (0xbc), region = 32  ;;  %p165_p3 = scmp.lt.s32.totalorder (!%p140_p2), %s394_s16, 7 }
   0xb   : > { %v471_v0 = vld [vmem:[%s583_s1 + $0x38] sm:$0xff]  ;;  %v473_v1 = vld [vmem:[%s583_s1 + $0x48] sm:$0xff]  ;;  %v470_v2 = vld [vmem:[%s583_s1 + $0x30] sm:$0xff]  ;;  %s587_s16 = smov (!%p165_p3, %s394_s16), 7  ;;  %vm284_vm0 = vcmask 261120  }
   0xc   : > { %291 = vmatpush.bf16.msra.mxu0 %v471_v0  ;;  %474 = vmatpush.bf16.msra.mxu2 %v471_v0  ;;  %v472_v3 = vld [vmem:[%s583_s1 + $0x40] sm:$0xff]  ;;  %s459_s23 = sshll.u32 %s587_s16, 3  ;;  %v469_v4 = vld [vmem:[%s583_s1 + $0x28] sm:$0xff]  ;;  %v467_v9 = vld [vmem:[%s583_s1 + $0x18] sm:$0xff] }
   0xd   : > { %316 = vmatpush.bf16.msra.mxu1 %v473_v1  ;;  %s169_s28 = scalar_lea.vmem %s582_s0, %s459_s23  ;;  %v468_v8 = vld [vmem:[%s583_s1 + $0x20] sm:$0xff]  ;;  %v466_v10 = vld [vmem:[%s583_s1 + $0x10] sm:$0xff]  ;;  %v465_v13 = vld [vmem:[%s583_s1 + $0x8] sm:$0xff]  ;;  %s175_s18 = scalar_lea.vmem %s585_s3, %s459_s23 }
   0xe   : > { %v460_v5 = vld [vmem:[%s169_s28 + $0x4] sm:$0xf]  ;;  %v403_v6 = vld [vmem:[%s169_s28 + $0x8] sm:$0xf0]  ;;  %v462_v11 = vld [vmem:[%s169_s28 + $0x14] sm:$0xf] }
   0xf   : > { %v406_v7 = vor.u32 %v460_v5, %v403_v6  ;;  %v411_v12 = vld [vmem:[%s169_s28 + $0x18] sm:$0xf0]  ;;  %v464_v15 = vld [vmem:[%s583_s1] sm:$0xff]  ;;  %v461_v17 = vld [vmem:[%s169_s28 + $0x4] sm:$0xf0] }
  0x10   : > { %292 = vmatpush.bf16.msra.mxu0 %v470_v2  ;;  %475 = vmatpush.bf16.msra.mxu2 %v470_v2  ;;  %v414_v14 = vor.u32 %v462_v11, %v411_v12  ;;  %v401_v16 = vld [vmem:[%s169_s28] sm:$0xf]  ;;  %v409_v18 = vld [vmem:[%s169_s28 + $0x10] sm:$0xf]  ;;  %v463_v19 = vld [vmem:[%s169_s28 + $0x14] sm:$0xf0] }
  0x11   : > { %317 = vmatpush.bf16.msra.mxu1 %v472_v3  ;;  %v402_v20 = vor.u32 %v461_v17, %v401_v16  ;;  %v410_v21 = vor.u32 %v463_v19, %v409_v18  ;;  %v490_v24 = vld [vmem:[%s584_s2] ss:$0 sm:$0xff] }
  0x14   : > { %293 = vmatpush.bf16.msra.mxu0 %v469_v4  ;;  %476 = vmatpush.bf16.msra.mxu2 %v469_v4 }
  0x15   : > { %455 = vmatmul.msk.bf16.vlgmr.msra.gmra.mxu1 %vm284_vm0, %v406_v7 }
  0x18   : > { %294 = vmatpush.bf16.msra.mxu0 %v468_v8  ;;  %477 = vmatpush.bf16.msra.mxu2 %v468_v8 }
  0x1c   : > { %295 = vmatpush.bf16.msra.mxu0 %v467_v9  ;;  %478 = vmatpush.bf16.msra.mxu2 %v467_v9 }
  0x20   : > { %296 = vmatpush.bf16.msra.mxu0 %v466_v10  ;;  %479 = vmatpush.bf16.msra.mxu2 %v466_v10 }
  0x24   : > { %297 = vmatpush.bf16.msra.mxu0 %v465_v13  ;;  %480 = vmatpush.bf16.msra.mxu2 %v465_v13 }
  0x25   : > { %456 = vmatmul.msk.bf16.gmra.mxu1 %vm284_vm0, %v414_v14 }
  0x28   : > { %298 = vmatpush.bf16.msra.mxu0 %v464_v15  ;;  %481 = vmatpush.bf16.msra.mxu2 %v464_v15 }
  0x2b   : > { %299 = vmatmul.bf16.vlgmr.msra.gmra.mxu0 %v402_v20  ;;  %304 = vmatmul.bf16.vlgmr.msra.gmra.mxu2 %v410_v21 }
  0x92   : > { %v319_v22 = vpop.f32.mrf.mxu1 }
  0x9a   : > { %v321_v23 = vpop.f32.mrf.mxu1 }
  0xa2   : > { %v324_v28 = vpop.f32.mrf.mxu1 }
  0xa8   : > { %v300_v25 = vpop.f32.mrf.mxu0 }
  0xa9   : > { %v301_v26 = vadd.f32 %v490_v24, %v300_v25 }
  0xaa   : > { %v326_v37 = vpop.f32.mrf.mxu1 }
  0xab   : > { %v320_v27 = vadd.f32 %v319_v22, %v301_v26 }
  0xad   : > { %329 = vst.msk [vmem:[%s175_s18] sm:$0xff] %vm284_vm0, %v320_v27 }
  0xae   : > { %v305_v29 = vpop.f32.mrf.mxu2 }
  0xaf   : > { %v306_v30 = vadd.f32 %v490_v24, %v305_v29 }
  0xb0   : > { %v302_v31 = vpop.f32.mrf.mxu0 }
  0xb1   : > { %v303_v32 = vadd.f32 %v490_v24, %v302_v31  ;;  %v325_v34 = vadd.f32 %v324_v28, %v306_v30 }
  0xb3   : > { %v322_v33 = vadd.f32 %v321_v23, %v303_v32  ;;  %331 = vst.msk [vmem:[%s175_s18 + $0x10] sm:$0xff] %vm284_vm0, %v325_v34 }
  0xb5   : > { %330 = vst.msk [vmem:[%s175_s18 + $0x8] sm:$0xff] %vm284_vm0, %v322_v33 }
  0xb6   : > { %v307_v35 = vpop.f32.mrf.mxu2 }
  0xb7   : > { %v308_v36 = vadd.f32 %v490_v24, %v307_v35 }
  0xb9   : > { %v327_v38 = vadd.f32 %v326_v37, %v308_v36 }
  0xbb   : > { %332 = vst.msk [vmem:[%s175_s18 + $0x18] sm:$0xff] %vm284_vm0, %v327_v38 }
  0xbc PF: > { %s13_s12 = sadd.s32 1, %s497_s12  }
  0xbd   : > { %p10_p4 = scmp.ge.s32.totalorder %s13_s12, 4  }
  0xbf   :  { %12 = sbr.rel (!%p10_p4) target bundleno = 1 (0x1), region = 62 }

</bundles_post_ra>
